<compile_context>
chip_gen: v7x
topology: tpu7x:2x2x1
jax: 0.10.0
libtpu: 0.0.40
codegen_flags: <defaults>
</compile_context>

<pallas_src>
import math
import functools

import jax
import jax.numpy as jnp
from jax.experimental import pallas as pl
from jax.experimental.pallas import tpu as pltpu


# --------------------------- K/V projection kernel ---------------------------
# Emits head-major bf16 K/V projections [B, H, S, d] so the attention kernel's
# batched matmuls read contiguous per-head tiles (transpose paid once per seq tile).

def _kv_proj_kernel(k_ref, v_ref, wk_ref, bk_ref, wv_ref, bv_ref,
                    kh_ref, vh_ref, *, head_num, d_k, d_v):
    T = k_ref.shape[0]
    kp = jnp.dot(k_ref[...].astype(jnp.bfloat16), wk_ref[...],
                 preferred_element_type=jnp.float32) + bk_ref[...]       # [T, H*d_k]
    vp = jnp.dot(v_ref[...].astype(jnp.bfloat16), wv_ref[...],
                 preferred_element_type=jnp.float32) + bv_ref[...]       # [T, H*d_v]
    kh_ref[...] = jnp.transpose(
        kp.astype(kh_ref.dtype).reshape(T, head_num, d_k), (1, 0, 2))    # [H, T, d_k]
    vh_ref[...] = jnp.transpose(
        vp.astype(vh_ref.dtype).reshape(T, head_num, d_v), (1, 0, 2))    # [H, T, d_v]


# ----------------------------- Attention kernel ------------------------------

def _mha_kernel(q_ref, mask_ref, kh_ref, vh_ref,
                wq_ref, bq_ref, wo_ref, bo_ref, out_ref,
                *, head_num, d_k, d_v, scale, use_bf16_exp):
    TQ = q_ref.shape[0]
    S = kh_ref.shape[1]

    # Q projection for this query tile (bf16 operands, f32 acc); 1/sqrt(d_k) folded
    # into Q so it is never applied to the full [H, TQ, S] score tensor.
    Q = jnp.dot(q_ref[...].astype(jnp.bfloat16), wq_ref[...],
                preferred_element_type=jnp.float32) + bq_ref[...]        # [TQ, H*d_k]
    Qh = jnp.transpose(
        (Q * scale).astype(jnp.bfloat16).reshape(TQ, head_num, d_k),
        (1, 0, 2))                                                       # [H, TQ, d_k]
    Kh = kh_ref[...]                                                     # [H, S, d_k]
    Vh = vh_ref[...]                                                     # [H, S, d_v]

    # Scores for all heads in one batched matmul (head = leading batch dim).
    scores = jnp.einsum('hqd,hkd->hqk', Qh, Kh,
                        preferred_element_type=jnp.float32)              # [H, TQ, S]

    # Key mask (broadcast over heads and query rows), computed once per tile.
    masked = (mask_ref[...] == 0).reshape(1, 1, S)
    scores = jnp.where(masked, -1000000000.0, scores)

    # Numerically stable softmax. max/sum stay f32; exp runs in bf16 only where the
    # EUP has a bf16 path (v6e/v7x); approx reciprocal uses the EUP slot.
    m = jnp.max(scores, axis=-1, keepdims=True)
    if use_bf16_exp:
        e = jnp.exp((scores - m).astype(jnp.bfloat16))                   # bf16 [H,TQ,S]
        s = jnp.sum(e, axis=-1, keepdims=True, dtype=jnp.float32)
        attn = e * pl.reciprocal(s, approx=True).astype(jnp.bfloat16)
    else:
        e = jnp.exp(scores - m)                                          # f32
        s = jnp.sum(e, axis=-1, keepdims=True)
        attn = (e * pl.reciprocal(s, approx=True)).astype(jnp.bfloat16)
    # TODO(synk): training-mode dropout on `attn` not implemented (eval-mode identity).

    # attn @ V for all heads, then the output projection fused into ONE matmul with
    # full H*d_v contraction depth (no per-head thin matmuls, no sum over heads).
    heads = jnp.einsum('hqk,hkd->hqd', attn, Vh,
                       preferred_element_type=jnp.float32)               # [H, TQ, d_v]
    heads2d = jnp.transpose(heads.astype(jnp.bfloat16),
                            (1, 0, 2)).reshape(TQ, head_num * d_v)       # [TQ, H*d_v]
    y = jnp.dot(heads2d, wo_ref[...],
                preferred_element_type=jnp.float32) + bo_ref[...]        # [TQ, O_pad]
    out_ref[...] = y.astype(out_ref.dtype)


# --------------------------------- Wrapper -----------------------------------

def multi_head_attention(q, k, v, mask, params, *, head_num):
    B, S, D = q.shape
    d_k = D // head_num
    wq, bq, wk, bk, wv, bv, wo, bo = params
    d_v = wv.shape[1] // head_num
    out_dim = wo.shape[1]                                    # == head_num * d_v

    # Generation-aware knobs.
    kind = ""
    try:
        kind = jax.devices()[0].device_kind.lower()
    except Exception:
        pass
    is_v7 = "v7" in kind
    use_bf16_exp = ("v6" in kind) or is_v7                   # bf16 EUP: v6e / v7x only
    target_tile = 128 if is_v7 else 256                      # v7x has 64 MiB VMEM

    # Robust seq tiling: pad S up to a multiple of the tile; padded KEY positions are
    # masked out (exact), padded QUERY rows are sliced off after the kernel.
    if S <= target_tile:
        TILE, S_pad = S, S
    else:
        TILE = target_tile
        S_pad = pl.cdiv(S, TILE) * TILE
    pad_s = S_pad - S
    if pad_s:
        q = jnp.pad(q, ((0, 0), (0, pad_s), (0, 0)))
        k = jnp.pad(k, ((0, 0), (0, pad_s), (0, 0)))
        v = jnp.pad(v, ((0, 0), (0, pad_s), (0, 0)))
        mask = jnp.pad(mask, ((0, 0), (0, 0), (0, pad_s)))   # zeros -> masked keys
    NQ = S_pad // TILE

    # Lane-dense output projection; skip padding entirely when already 128-aligned.
    o_pad = ((out_dim + 127) // 128) * 128
    if o_pad != out_dim:
        wo_p = jnp.pad(wo, ((0, 0), (0, o_pad - out_dim)))
        bo_p = jnp.pad(bo, ((0, 0), (0, o_pad - out_dim)))
    else:
        wo_p, bo_p = wo, bo

    # bf16 MXU weight operands (small, one-time); biases stay f32 (added to f32 acc).
    wq_b = wq.astype(jnp.bfloat16)
    wk_b = wk.astype(jnp.bfloat16)
    wv_b = wv.astype(jnp.bfloat16)
    wo_b = wo_p.astype(jnp.bfloat16)

    try:
        vmem_cap = int(pltpu.get_tpu_info().vmem_capacity_bytes)
    except Exception:
        vmem_cap = 128 * 1024 * 1024
    vmem_limit = int(min(96 * 1024 * 1024, (vmem_cap * 3) // 4))

    full2d = lambda arr: pl.BlockSpec(arr.shape, lambda b, i: (0, 0))

    # ---- Pass 1: K/V projection to head-major bf16 [B, H, S_pad, d] -------------
    kv_kernel = functools.partial(_kv_proj_kernel, head_num=head_num, d_k=d_k, d_v=d_v)
    kproj, vproj = pl.pallas_call(
        kv_kernel,
        out_shape=(jax.ShapeDtypeStruct((B, head_num, S_pad, d_k), jnp.bfloat16),
                   jax.ShapeDtypeStruct((B, head_num, S_pad, d_v), jnp.bfloat16)),
        grid_spec=pltpu.PrefetchScalarGridSpec(
            num_scalar_prefetch=0,
            grid=(B, NQ),
            in_specs=[
                pl.BlockSpec((None, TILE, D), lambda b, si: (b, si, 0)),   # k tile
                pl.BlockSpec((None, TILE, D), lambda b, si: (b, si, 0)),   # v tile
                full2d(wk_b), full2d(bk),                                  # W_K, b_K
                full2d(wv_b), full2d(bv),                                  # W_V, b_V
            ],
            out_specs=[
                pl.BlockSpec((None, head_num, TILE, d_k), lambda b, si: (b, 0, si, 0)),
                pl.BlockSpec((None, head_num, TILE, d_v), lambda b, si: (b, 0, si, 0)),
            ],
        ),
        compiler_params=pltpu.CompilerParams(
            dimension_semantics=("parallel", "parallel"),
            vmem_limit_bytes=vmem_limit),
    )(k, v, wk_b, bk, wv_b, bv)

    # ---- Pass 2: attention + fused output projection ----------------------------
    kernel = functools.partial(_mha_kernel, head_num=head_num, d_k=d_k, d_v=d_v,
                               scale=1.0 / math.sqrt(d_k), use_bf16_exp=use_bf16_exp)
    out_padded = pl.pallas_call(
        kernel,
        # Output kept f32 for bit-closeness to the reference; emit bf16 instead if the
        # downstream consumer accepts it (halves output writeback).
        out_shape=jax.ShapeDtypeStruct((B, S_pad, o_pad), jnp.float32),
        grid_spec=pltpu.PrefetchScalarGridSpec(
            num_scalar_prefetch=0,
            grid=(B, NQ),
            in_specs=[
                pl.BlockSpec((None, TILE, D), lambda b, qi: (b, qi, 0)),      # q tile
                pl.BlockSpec((None, 1, S_pad), lambda b, qi: (b, 0, 0)),      # mask
                pl.BlockSpec((None, head_num, S_pad, d_k),
                             lambda b, qi: (b, 0, 0, 0)),                     # K proj
                pl.BlockSpec((None, head_num, S_pad, d_v),
                             lambda b, qi: (b, 0, 0, 0)),                     # V proj
                full2d(wq_b), full2d(bq),                                     # W_Q, b_Q
                full2d(wo_b), full2d(bo_p),                                   # W_O, b_O
            ],
            out_specs=pl.BlockSpec((None, TILE, o_pad), lambda b, qi: (b, qi, 0)),
        ),
        compiler_params=pltpu.CompilerParams(
            dimension_semantics=("parallel", "parallel"),
            vmem_limit_bytes=vmem_limit),
    )(q, mask, kproj, vproj, wq_b, bq, wo_b, bo_p)

    out = out_padded
    if pad_s:
        out = out[:, :S, :]
    if o_pad != out_dim:
        out = out[..., :out_dim]
    return out


# --------------------------------- Reference ----------------------------------

def _reference(q, k, v, mask, params, *, head_num):
    """Pure-JAX f32 reference mirroring the PyTorch forward (eval-mode dropout)."""
    B, S, D = q.shape
    d_k = D // head_num
    wq, bq, wk, bk, wv, bv, wo, bo = params
    d_v = wv.shape[1] // head_num
    Q = (q @ wq + bq[0]).reshape(B, S, head_num, d_k).transpose(0, 2, 1, 3)
    K = (k @ wk + bk[0]).reshape(B, S, head_num, d_k).transpose(0, 2, 1, 3)
    V = (v @ wv + bv[0]).reshape(B, S, head_num, d_v).transpose(0, 2, 1, 3)
    scores = jnp.einsum('bhqd,bhkd->bhqk', Q, K) / math.sqrt(d_k)
    scores = jnp.where(mask[:, None, :, :] == 0, -1000000000.0, scores)
    attn = jax.nn.softmax(scores, axis=-1)
    heads = jnp.einsum('bhqk,bhkd->bhqd', attn, V)
    heads = heads.transpose(0, 2, 1, 3).reshape(B, S, head_num * d_v)
    return heads @ wo + bo[0]


if __name__ == "__main__":
    B, S, d_model, head_num = 2, 8, 32, 4
    d_k = d_model // head_num
    d_v = d_k

    key = jax.random.PRNGKey(0)
    keys = jax.random.split(key, 12)

    def linear_init(kw, kb, fan_in, fan_out):
        # nn.Linear default init: U(-1/sqrt(fan_in), 1/sqrt(fan_in))
        bound = 1.0 / math.sqrt(fan_in)
        w = jax.random.uniform(kw, (fan_in, fan_out), jnp.float32, -bound, bound)
        b = jax.random.uniform(kb, (1, fan_out), jnp.float32, -bound, bound)
        return w, b

    wq, bq = linear_init(keys[0], keys[1], d_model, head_num * d_k)
    wk, bk = linear_init(keys[2], keys[3], d_model, head_num * d_k)
    wv, bv = linear_init(keys[4], keys[5], d_model, head_num * d_v)
    wo, bo = linear_init(keys[6], keys[7], head_num * d_v, head_num * d_v)
    params = (wq, bq, wk, bk, wv, bv, wo, bo)

    q = jax.random.normal(keys[8], (B, S, d_model), jnp.float32)
    k = jax.random.normal(keys[9], (B, S, d_model), jnp.float32)
    v = jax.random.normal(keys[10], (B, S, d_model), jnp.float32)
    # mask: [B, 1, S]; last two key positions of batch 1 are masked out.
    mask = jnp.ones((B, 1, S), jnp.int32)
    mask = mask.at[1, 0, S - 2:].set(0)

    out = multi_head_attention(q, k, v, mask, params, head_num=head_num)
    out = jax.block_until_ready(out)

    ref = _reference(q, k, v, mask, params, head_num=head_num)
    # bf16 MXU operands, bf16 exp (on v6e/v7x) and the approx reciprocal shift results
    # at the ~1e-3..1e-2 level vs the pure-f32 reference; tolerance loosened accordingly.
    if not jnp.allclose(out, ref, atol=3e-2, rtol=3e-2):
        raise AssertionError("Pallas MHA output mismatch vs reference")

    print("KERNEL_OK")
</pallas_src>

<mosaic_0001>
module attributes {stable_mosaic.version = 11 : i64} {
  func.func @_kv_proj_kernel(%arg0: i32, %arg1: i32, %arg2: memref<1x8x32xf32, #tpu.memory_space<vmem>>, %arg3: memref<1x8x32xf32, #tpu.memory_space<vmem>>, %arg4: memref<32x32xbf16, #tpu.memory_space<vmem>>, %arg5: memref<1x32xf32, #tpu.memory_space<vmem>>, %arg6: memref<32x32xbf16, #tpu.memory_space<vmem>>, %arg7: memref<1x32xf32, #tpu.memory_space<vmem>>, %arg8: memref<1x4x8x8xbf16, #tpu.memory_space<vmem>>, %arg9: memref<1x4x8x8xbf16, #tpu.memory_space<vmem>>) attributes {dimension_semantics = [#tpu.dimension_semantics<parallel>, #tpu.dimension_semantics<parallel>], iteration_bounds = array<i64: 2, 1>, scalar_prefetch = 0 : i64, scratch_operands = 0 : i64, tpu.core_type = #tpu.core_type<tc>, window_params = [{transform_indices = @transform_0, window_bounds = array<i64: 1, 8, 32>}, {transform_indices = @transform_1, window_bounds = array<i64: 1, 8, 32>}, {pipeline_mode = #tpu.pipeline_mode<synchronous>, transform_indices = @transform_2, window_bounds = array<i64: 32, 32>}, {pipeline_mode = #tpu.pipeline_mode<synchronous>, transform_indices = @transform_3, window_bounds = array<i64: 1, 32>}, {pipeline_mode = #tpu.pipeline_mode<synchronous>, transform_indices = @transform_4, window_bounds = array<i64: 32, 32>}, {pipeline_mode = #tpu.pipeline_mode<synchronous>, transform_indices = @transform_5, window_bounds = array<i64: 1, 32>}, {transform_indices = @transform_6, window_bounds = array<i64: 1, 4, 8, 8>}, {transform_indices = @transform_7, window_bounds = array<i64: 1, 4, 8, 8>}]} {
    %c0 = arith.constant 0 : index
    %c0_0 = arith.constant 0 : index
    %c0_1 = arith.constant 0 : index
    %0 = vector.load %arg2[%c0, %c0_0, %c0_1] : memref<1x8x32xf32, #tpu.memory_space<vmem>>, vector<1x8x32xf32>
    %1 = vector.shape_cast %0 : vector<1x8x32xf32> to vector<8x32xf32>
    %2 = arith.truncf %1 : vector<8x32xf32> to vector<8x32xbf16>
    %c0_2 = arith.constant 0 : index
    %c0_3 = arith.constant 0 : index
    %3 = vector.load %arg4[%c0_2, %c0_3] : memref<32x32xbf16, #tpu.memory_space<vmem>>, vector<32x32xbf16>
    %cst = arith.constant dense<0.000000e+00> : vector<8x32xf32>
    %4 = tpu.matmul %2, %3, %cst {dimension_numbers = #tpu.dot_dimension_numbers<[1], [0], [0], [1], [0, 0, 1, 1], [], []>} : vector<8x32xbf16>, vector<32x32xbf16>, vector<8x32xf32> -> vector<8x32xf32>
    %c0_4 = arith.constant 0 : index
    %c0_5 = arith.constant 0 : index
    %5 = vector.load %arg5[%c0_4, %c0_5] : memref<1x32xf32, #tpu.memory_space<vmem>>, vector<1x32xf32>
    %6 = vector.broadcast %5 : vector<1x32xf32> to vector<8x32xf32>
    %7 = arith.addf %4, %6 : vector<8x32xf32>
    %c0_6 = arith.constant 0 : index
    %c0_7 = arith.constant 0 : index
    %c0_8 = arith.constant 0 : index
    %8 = vector.load %arg3[%c0_6, %c0_7, %c0_8] : memref<1x8x32xf32, #tpu.memory_space<vmem>>, vector<1x8x32xf32>
    %9 = vector.shape_cast %8 : vector<1x8x32xf32> to vector<8x32xf32>
    %10 = arith.truncf %9 : vector<8x32xf32> to vector<8x32xbf16>
    %c0_9 = arith.constant 0 : index
    %c0_10 = arith.constant 0 : index
    %11 = vector.load %arg6[%c0_9, %c0_10] : memref<32x32xbf16, #tpu.memory_space<vmem>>, vector<32x32xbf16>
    %cst_11 = arith.constant dense<0.000000e+00> : vector<8x32xf32>
    %12 = tpu.matmul %10, %11, %cst_11 {dimension_numbers = #tpu.dot_dimension_numbers<[1], [0], [0], [1], [0, 0, 1, 1], [], []>} : vector<8x32xbf16>, vector<32x32xbf16>, vector<8x32xf32> -> vector<8x32xf32>
    %c0_12 = arith.constant 0 : index
    %c0_13 = arith.constant 0 : index
    %13 = vector.load %arg7[%c0_12, %c0_13] : memref<1x32xf32, #tpu.memory_space<vmem>>, vector<1x32xf32>
    %14 = vector.broadcast %13 : vector<1x32xf32> to vector<8x32xf32>
    %15 = arith.addf %12, %14 : vector<8x32xf32>
    %16 = arith.truncf %7 : vector<8x32xf32> to vector<8x32xbf16>
    %17 = vector.shape_cast %16 : vector<8x32xbf16> to vector<8x4x8xbf16>
    %18 = tpu.transpose %17, [1, 0, 2] : vector<8x4x8xbf16> -> vector<4x8x8xbf16>
    %c0_14 = arith.constant 0 : index
    %c0_15 = arith.constant 0 : index
    %c0_16 = arith.constant 0 : index
    %c0_17 = arith.constant 0 : index
    %19 = vector.load %arg8[%c0_14, %c0_15, %c0_16, %c0_17] : memref<1x4x8x8xbf16, #tpu.memory_space<vmem>>, vector<1x4x8x8xbf16>
    %20 = vector.shape_cast %19 : vector<1x4x8x8xbf16> to vector<4x8x8xbf16>
    %21 = vector.shape_cast %18 : vector<4x8x8xbf16> to vector<1x4x8x8xbf16>
    tpu.vector_store %arg8[%c0_14, %c0_15, %c0_16, %c0_17], %21 {strides = array<i32>} : memref<1x4x8x8xbf16, #tpu.memory_space<vmem>>, vector<1x4x8x8xbf16>,
    %22 = arith.truncf %15 : vector<8x32xf32> to vector<8x32xbf16>
    %23 = vector.shape_cast %22 : vector<8x32xbf16> to vector<8x4x8xbf16>
    %24 = tpu.transpose %23, [1, 0, 2] : vector<8x4x8xbf16> -> vector<4x8x8xbf16>
    %c0_18 = arith.constant 0 : index
    %c0_19 = arith.constant 0 : index
    %c0_20 = arith.constant 0 : index
    %c0_21 = arith.constant 0 : index
    %25 = vector.load %arg9[%c0_18, %c0_19, %c0_20, %c0_21] : memref<1x4x8x8xbf16, #tpu.memory_space<vmem>>, vector<1x4x8x8xbf16>
    %26 = vector.shape_cast %25 : vector<1x4x8x8xbf16> to vector<4x8x8xbf16>
    %27 = vector.shape_cast %24 : vector<4x8x8xbf16> to vector<1x4x8x8xbf16>
    tpu.vector_store %arg9[%c0_18, %c0_19, %c0_20, %c0_21], %27 {strides = array<i32>} : memref<1x4x8x8xbf16, #tpu.memory_space<vmem>>, vector<1x4x8x8xbf16>,
    return
  }
  func.func @transform_0(%arg0: i32, %arg1: i32) -> (i32, i32, i32) {
    %c0_i32 = arith.constant 0 : i32
    %c0_i32_0 = arith.constant 0 : i32
    return %arg0, %arg1, %c0_i32 : i32, i32, i32
  }
  func.func @transform_1(%arg0: i32, %arg1: i32) -> (i32, i32, i32) {
    %c0_i32 = arith.constant 0 : i32
    %c0_i32_0 = arith.constant 0 : i32
    return %arg0, %arg1, %c0_i32 : i32, i32, i32
  }
  func.func @transform_2(%arg0: i32, %arg1: i32) -> (i32, i32) {
    %c0_i32 = arith.constant 0 : i32
    %c0_i32_0 = arith.constant 0 : i32
    %c0_i32_1 = arith.constant 0 : i32
    return %c0_i32, %c0_i32_0 : i32, i32
  }
  func.func @transform_3(%arg0: i32, %arg1: i32) -> (i32, i32) {
    %c0_i32 = arith.constant 0 : i32
    %c0_i32_0 = arith.constant 0 : i32
    %c0_i32_1 = arith.constant 0 : i32
    return %c0_i32, %c0_i32_0 : i32, i32
  }
  func.func @transform_4(%arg0: i32, %arg1: i32) -> (i32, i32) {
    %c0_i32 = arith.constant 0 : i32
    %c0_i32_0 = arith.constant 0 : i32
    %c0_i32_1 = arith.constant 0 : i32
    return %c0_i32, %c0_i32_0 : i32, i32
  }
  func.func @transform_5(%arg0: i32, %arg1: i32) -> (i32, i32) {
    %c0_i32 = arith.constant 0 : i32
    %c0_i32_0 = arith.constant 0 : i32
    %c0_i32_1 = arith.constant 0 : i32
    return %c0_i32, %c0_i32_0 : i32, i32
  }
  func.func @transform_6(%arg0: i32, %arg1: i32) -> (i32, i32, i32, i32) {
    %c0_i32 = arith.constant 0 : i32
    %c0_i32_0 = arith.constant 0 : i32
    %c0_i32_1 = arith.constant 0 : i32
    return %arg0, %c0_i32, %arg1, %c0_i32_0 : i32, i32, i32, i32
  }
  func.func @transform_7(%arg0: i32, %arg1: i32) -> (i32, i32, i32, i32) {
    %c0_i32 = arith.constant 0 : i32
    %c0_i32_0 = arith.constant 0 : i32
    %c0_i32_1 = arith.constant 0 : i32
    return %arg0, %c0_i32, %arg1, %c0_i32_0 : i32, i32, i32, i32
  }
}

</mosaic_0001>

<bundles_post_ra>
// kernel: tpu_custom_call.1
= control target key start
LH: loop header
LB: loop body
LE: loop exit
PB: predicated region body
PF: predicated region fallthrough
CT: control target
= control target key end

     0   :  { %s2118_s0 = inlined_call_operand.hbm [shape: f32[2,8,32], index: 0, kind: input, shape index: {}]   ;;  %s2119_s1 = inlined_call_operand.hbm [shape: f32[2,8,32], index: 1, kind: input, shape index: {}]   ;;  %s2120_s2 = inlined_call_operand.hbm [shape: bf16[32,32], index: 2, kind: input, shape index: {}]   ;;  %s2121_s3 = inlined_call_operand.hbm [shape: f32[1,32], index: 3, kind: input, shape index: {}]   ;;  %s2122_s4 = inlined_call_operand.hbm [shape: bf16[32,32], index: 4, kind: input, shape index: {}]   ;;  %s2123_s5 = inlined_call_operand.hbm [shape: f32[1,32], index: 5, kind: input, shape index: {}]   ;;  %s2124_s6 = inlined_call_operand.hbm [shape: bf16[2,4,8,8], index: 6, kind: output, shape index: {0}]   ;;  %s2125_s7 = inlined_call_operand.hbm [shape: bf16[2,4,8,8], index: 7, kind: output, shape index: {1}]  }
   0x1   :  { %2132 = sst [smem:[#allocation24_spill]] %s2120_s2 }
   0x2   :  { %2133 = sst [smem:[#allocation25_spill]] %s2121_s3 }
   0x3   :  { %2134 = sst [smem:[#allocation26_spill]] %s2122_s4 }
   0x4   :  { %2135 = sst [smem:[#allocation27_spill]] %s2123_s5 }
   0x5   :  { %2136 = sst [smem:[#allocation28_spill]] %s2125_s7 }
   0x6   :  { %13 = vsyncpa [#allocation3], 0 }
   0x7   :  { %15 = vsyncpa [#allocation3 + $0x1], 0 }
   0x8   :  { %16 = vsyncpa [#allocation6], 0 }
   0x9   :  { %18 = vsyncpa [#allocation6 + $0x1], 0 }
   0xa   :  { %19 = vsyncpa [#allocation9], 0 }
   0xb   :  { %20 = vsyncpa [#allocation12], 0 }
   0xc   :  { %21 = vsyncpa [#allocation4], 0 }
   0xd   :  { %23 = vsyncpa [#allocation4 + $0x1], 0 }
   0xe   :  { %24 = vsyncpa [#allocation15], 0 }
   0xf   :  { %26 = vsyncpa [#allocation15 + $0x1], 0  ;;  %s1682_s24 = smov 0   ;;  %s1684_s25 = smov 0  }
  0x10   :  { %s1686_s26 = smov 0   ;;  %s1688_s27 = smov 0  }
  0x11   :  { %s1690_s28 = smov 0   ;;  %s1692_s29 = smov 0  }
  0x12 LB: > { %s1713_s30 = sadd.s32 4294967295, %s1620_s29   ;;  %p1130_p0 = scmp.ge.s32.totalorder %s1620_s29, 1  ;;  %s1620_s29 = sphi %s1692_s29, %s32_s29   ;;  %s1616_s28 = sphi %s1690_s28, %s2168_s28   ;;  %s1612_s27 = sphi %s1688_s27, %s2167_s27   ;;  %s1608_s26 = sphi %s1686_s26, %s2166_s26   ;;  %s1604_s25 = sphi %s1684_s25, %s2165_s25   ;;  %s1600_s24 = sphi %s1682_s24, %s2164_s24  }
  0x13   : > { %p2127_p1 = scmp.eq.s32.totalorder %s1713_s30, 0  ;;  %p245_p2 = scmp.lt.s32.totalorder %s1620_s29, 3 }
  0x14   : > { %s1622_s9 = smov [#allocation7]   ;;  %s1623_s12 = smov [#allocation8]  }
  0x15   : > { %p1718_p3 = pnand %p1130_p0, %p245_p2  ;;  %s257_s10 = sshll.u32 %s1622_s9, 4  ;;  %s1722_s10 = int_to_ptr.vmem [resolvable:$true] %s257_s10 }
  0x16   : > { %s271_s13 = sshll.u32 %s1623_s12, 4  ;;  %s1624_s14 = smov [#allocation10]   ;;  %s1733_s13 = int_to_ptr.vmem [resolvable:$true] %s271_s13 }
  0x17   : > { %s2137_s8 = scalar_select %p1718_p3, 1, 0 }
  0x18   : > { %p1213_p4 = pneg %p1718_p3  ;;  %s1735_s15 = sshll.u32 %s1624_s14, 4  ;;  %s282_s15 = int_to_ptr.vmem [resolvable:$true] %s1735_s15 }
  0x19   : > { %s2139_s2 = sld [smem:[#allocation24_spill]] }
  0x1a   : > { %p1729_p6 = pnand %p1213_p4, %p2127_p1 }
  0x1c   : > { %p1745_p8 = pneg %p1729_p6 }
  0x1f   : > { %s1318_s18 = scalar_lea.hbm %s2139_s2, 256 }
  0x20   : > { %p1319_p7 = scmp.ne.s32.totalorder %s2139_s2, %s1318_s18  ;;  %p1325_p11 = scmp.lt.u32.totalorder %s1318_s18, %s2139_s2 }
  0x22   : > { %p1321_p9 = pnand %p1745_p8, %p1319_p7 }
  0x24   : > { %p1322_p10 = pneg %p1321_p9 }
  0x26   : > { %p1327_p12 = pnand %p1325_p11, %p1322_p10 }
  0x28   : > { %1330 = shalt.err (!%p1327_p12)
}
  0x29   : > { %s1331_s9 = scalar_lea.vmem %s1722_s10, 256  ;;  %p1339_p4 = scmp.lt.s32.totalorder %s1722_s10, %s1722_s10 }
  0x2a   : > { %p1332_p13 = scmp.ne.s32.totalorder %s1722_s10, %s1331_s9  ;;  %p1340_p5 = scmp.lt.s32.totalorder %s1331_s9, %s1331_s9 }
  0x2c   : > { %p1334_p0 = pnand %p1332_p13, %p1745_p8  ;;  %p1341_p7 = por %p1340_p5, %p1339_p4 }
  0x2e   : > { %p1335_p2 = pneg %p1334_p0 }
  0x30   : > { %p1342_p9 = pnand %p1341_p7, %p1335_p2 }
  0x32   : > { %1345 = shalt.err (!%p1342_p9)
}
  0x33   : > { %s1625_s12 = smov 64   ;;  %s1626_s14 = smov 4  }
  0x34   : > { %1216 = dma.hbm_to_vmem [thread:$0]  (!%p1729_p6), %s2139_s2, 256, %s1722_s10, [#allocation6], %s1625_s12, %s1625_s12, %s1626_s14  }
  0x35   : > { %s2141_s3 = sld [smem:[#allocation25_spill]] }
  0x3b   : > { %s1346_s20 = scalar_lea.hbm %s2141_s3, 16 }
  0x3c   : > { %p1347_p5 = scmp.ne.s32.totalorder %s2141_s3, %s1346_s20  ;;  %p1353_p12 = scmp.lt.u32.totalorder %s1346_s20, %s2141_s3 }
  0x3e   : > { %p1349_p10 = pnand %p1347_p5, %p1745_p8 }
  0x40   : > { %p1350_p11 = pneg %p1349_p10 }
  0x42   : > { %p1355_p13 = pnand %p1353_p12, %p1350_p11 }
  0x44   : > { %1358 = shalt.err (!%p1355_p13)
}
  0x45   : > { %s1359_s10 = scalar_lea.vmem %s1733_s13, 16  ;;  %s1366_s16 = scalar_lea.vmem %s1733_s13, 32 }
  0x46   : > { %p1360_p0 = scmp.ne.s32.totalorder %s1733_s13, %s1359_s10  ;;  %p1367_p7 = scmp.lt.s32.totalorder %s1733_s13, %s1733_s13 }
  0x47   : > { %p1368_p9 = scmp.lt.s32.totalorder %s1366_s16, %s1359_s10 }
  0x48   : > { %p1362_p2 = pnand %p1360_p0, %p1745_p8 }
  0x49   : > { %p1369_p5 = por %p1368_p9, %p1367_p7 }
  0x4a   : > { %p1363_p4 = pneg %p1362_p2 }
  0x4c   : > { %p1370_p10 = pnand %p1369_p5, %p1363_p4 }
  0x4e   : > { %1373 = shalt.err (!%p1370_p10)
}
  0x4f   : > { %1219 = dma.hbm_to_vmem [thread:$0]  (!%p1729_p6), %s2141_s3, 16, %s1733_s13, [#allocation9]  }
  0x50   : > { %s2142_s4 = sld [smem:[#allocation26_spill]] }
  0x56   : > { %s1374_s20 = scalar_lea.hbm %s2142_s4, 256 }
  0x57   : > { %p1375_p11 = scmp.ne.s32.totalorder %s2142_s4, %s1374_s20  ;;  %p1381_p0 = scmp.lt.u32.totalorder %s1374_s20, %s2142_s4 }
  0x59   : > { %p1377_p12 = pnand %p1375_p11, %p1745_p8 }
  0x5b   : > { %p1378_p13 = pneg %p1377_p12 }
  0x5d   : > { %p1383_p2 = pnand %p1381_p0, %p1378_p13 }
  0x5f   : > { %1386 = shalt.err (!%p1383_p2)
}
  0x60   : > { %s1387_s16 = scalar_lea.vmem %s282_s15, 256  ;;  %p1395_p5 = scmp.lt.s32.totalorder %s282_s15, %s282_s15 }
  0x61   : > { %p1388_p4 = scmp.ne.s32.totalorder %s282_s15, %s1387_s16  ;;  %p1396_p10 = scmp.lt.s32.totalorder %s1387_s16, %s1387_s16 }
  0x63   : > { %p1390_p7 = pnand %p1388_p4, %p1745_p8  ;;  %p1397_p1 = por %p1396_p10, %p1395_p5 }
  0x65   : > { %p1391_p9 = pneg %p1390_p7 }
  0x67   : > { %p1398_p3 = pnand %p1397_p1, %p1391_p9 }
  0x69   : > { %1401 = shalt.err (!%p1398_p3)
}
  0x6a   : > { %1222 = dma.hbm_to_vmem [thread:$0]  (!%p1729_p6), %s2142_s4, 256, %s282_s15, [#allocation9], %s1625_s12, %s1625_s12, %s1626_s14  }
  0x6b   : > { %s1627_s17 = smov [#allocation11]   ;;  %s2143_s5 = sld [smem:[#allocation27_spill]] }
  0x6c   : > { %s295_s18 = sshll.u32 %s1627_s17, 4  ;;  %s296_s18 = int_to_ptr.vmem [resolvable:$true] %s295_s18 }
  0x71   : > { %s1402_s22 = scalar_lea.hbm %s2143_s5, 16 }
  0x72   : > { %p1403_p1 = scmp.ne.s32.totalorder %s2143_s5, %s1402_s22  ;;  %p1409_p12 = scmp.lt.u32.totalorder %s1402_s22, %s2143_s5 }
  0x74   : > { %p1405_p3 = pnand %p1403_p1, %p1745_p8 }
  0x76   : > { %p1406_p11 = pneg %p1405_p3 }
  0x78   : > { %p1411_p13 = pnand %p1409_p12, %p1406_p11 }
  0x7a   : > { %1414 = shalt.err (!%p1411_p13)
}
  0x7b   : > { %s1415_s15 = scalar_lea.vmem %s296_s18, 16  ;;  %s1422_s12 = scalar_lea.vmem %s296_s18, 32 }
  0x7c   : > { %p1416_p0 = scmp.ne.s32.totalorder %s296_s18, %s1415_s15  ;;  %p1423_p7 = scmp.lt.s32.totalorder %s296_s18, %s296_s18 }
  0x7d   : > { %p1424_p9 = scmp.lt.s32.totalorder %s1422_s12, %s1415_s15 }
  0x7e   : > { %p1418_p2 = pnand %p1416_p0, %p1745_p8 }
  0x7f   : > { %p1425_p5 = por %p1424_p9, %p1423_p7 }
  0x80   : > { %p1419_p4 = pneg %p1418_p2 }
  0x82   : > { %p1426_p10 = pnand %p1425_p5, %p1419_p4 }
  0x84   : > { %1429 = shalt.err (!%p1426_p10)
}
  0x85   : > { %1225 = dma.hbm_to_vmem [thread:$0]  (!%p1729_p6), %s2143_s5, 16, %s296_s18, [#allocation12]  }
  0x86   : > { %s1129_s21 = sadd.s32 4294967294, %s1620_s29   ;;  %s44_s7 = sadd.s32 1, %s1616_s28 }
  0x87   : > { %p46_p8 = scmp.ge.s32.totalorder %s44_s7, 2  ;;  %s53_s11 = sadd.s32 1, %s1608_s26 }
  0x88   : > { %p60_p1 = scmp.ne.s32.totalorder %s1608_s26, %s1604_s25  ;;  %p61_p3 = scmp.eq.s32.totalorder %s1620_s29, 0 }
  0x89   : > { %s2170_s7 = smov (%p46_p8, %s44_s7), 0  ;;  %p66_p12 = scmp.ne.s32.totalorder %s1604_s25, %s1600_s24 }
  0x8a   : > { %2144 = sst [smem:[#allocation23_spill]] %s2170_s7  ;;  %p1841_p11 = por %p61_p3, %p60_p1 }
  0x8b   : > { %s48_s18 = ssub.s32 %s1616_s28, %s2170_s7  ;;  %p204_p6 = scmp.eq.s32.totalorder %s1713_s30, 1 }
  0x8c   : > { %p51_p13 = scmp.eq.s32.totalorder %s48_s18, 0  ;;  %p2146_p0 = scmp.eq.s32.totalorder %s1713_s30, 0 }
  0x8d   : > { %p1856_p4 = por %p204_p6, %p60_p1  ;;  %p210_p7 = scmp.eq.s32.totalorder %s1129_s21, 1 }
  0x8e   : > { %p1852_p2 = por %p2146_p0, %p66_p12  ;;  %p1244_p5 = scmp.lt.s32.totalorder %s1620_s29, 2 }
  0x8f   : > { %s2148_s20 = scalar_select %p1856_p4, 1, 0 }
  0x90   : > { %s2147_s19 = scalar_select %p1852_p2, 1, 0 }
  0x91   : > { %s1861_s22 = scalar_select %p51_p13, %s1608_s26, %s53_s11  }
  0x92   : > { %p1863_p9 = por %p210_p7, %p66_p12  ;;  %s306_s9 = sand.u32 1, %s1608_s26  }
  0x93   : > { %s1137_s10 = sshll.u32 %s1616_s28, 7  ;;  %s1870_s16 = sshll.u32 %s306_s9, 3 }
  0x94   : > { %s2149_s23 = scalar_select %p1863_p9, 1, 0 }
  0x95   : > { %s1875_s14 = scalar_lea.hbm %s2118_s0, %s1137_s10  ;;  %s310_s13 = scalar_lea.vmem [#allocation2], %s1870_s16 }
  0x96   : > { %s318_s21 = sshll.u32 %s310_s13, 4  ;;  %p1880_p10 = pnand %p1244_p5, %p1841_p11  ;;  %s1884_s21 = int_to_ptr.vmem [resolvable:$true] %s318_s21 }
  0x97   : > { %s1889_s12 = scalar_lea.hbm %s2119_s1, %s1137_s10  ;;  %s307_s2 = scalar_lea.sflag [#allocation3], %s306_s9 }
  0x98   : > { %s1430_s3 = scalar_lea.hbm %s1875_s14, 128  ;;  %p1432_p1 = pneg %p1880_p10 }
  0x99   : > { %p1431_p8 = scmp.ne.s32.totalorder %s1875_s14, %s1430_s3  ;;  %s1435_s4 = scalar_lea.hbm %s2118_s0, 256 }
  0x9a   : > { %p1436_p12 = scmp.lt.u32.totalorder %s1875_s14, %s2118_s0  ;;  %p1437_p6 = scmp.lt.u32.totalorder %s1435_s4, %s1430_s3 }
  0x9b   : > { %p1433_p3 = pnand %p1432_p1, %p1431_p8  ;;  %p1439_p0 = scmp.lt.u32.totalorder %s1430_s3, %s1875_s14 }
  0x9c   : > { %p1438_p13 = por %p1437_p6, %p1436_p12 }
  0x9d   : > { %p1434_p11 = pneg %p1433_p3 }
  0x9e   : > { %p1440_p7 = por %p1439_p0, %p1438_p13 }
  0xa0   : > { %p1441_p5 = pnand %p1440_p7, %p1434_p11 }
  0xa2   : > { %1444 = shalt.err (!%p1441_p5)
}
  0xa3   : > { %s1445_s9 = scalar_lea.vmem %s1884_s21, 128  ;;  %s1628_s10 = smov [#allocation2]  }
  0xa4   : > { %p1446_p8 = scmp.ne.s32.totalorder %s1884_s21, %s1445_s9  ;;  %s1450_s18 = sshll.u32 %s1628_s10, 4  ;;  %s1451_s18 = int_to_ptr.vmem [resolvable:$false] %s1450_s18 }
  0xa5   : > { %s1452_s5 = scalar_lea.vmem %s1451_s18, 256  ;;  %p1453_p4 = scmp.lt.s32.totalorder %s1884_s21, %s1451_s18 }
  0xa6   : > { %p1448_p3 = pnand %p1446_p8, %p1432_p1  ;;  %p1454_p12 = scmp.lt.s32.totalorder %s1452_s5, %s1445_s9 }
  0xa8   : > { %p1449_p9 = pneg %p1448_p3  ;;  %p1455_p6 = por %p1454_p12, %p1453_p4 }
  0xaa   : > { %p1456_p13 = pnand %p1455_p6, %p1449_p9 }
  0xac   : > { %1459 = shalt.err (!%p1456_p13)
}
  0xad   : > { %1229 = dma.hbm_to_vmem [thread:$0]  (!%p1880_p10), %s1875_s14, 128, %s1884_s21, %s307_s2  }
  0xae   : > { %s325_s3 = sand.u32 1, %s1620_s29   ;;  %s329_s4 = scalar_lea.vmem [#allocation5], %s1870_s16 }
  0xaf   : > { %s337_s7 = sshll.u32 %s329_s4, 4  ;;  %s326_s15 = scalar_lea.sflag [#allocation6], %s325_s3  ;;  %s338_s7 = int_to_ptr.vmem [resolvable:$true] %s337_s7 }
  0xb0   : > { %s1460_s17 = scalar_lea.hbm %s1889_s12, 128  ;;  %s1465_s10 = scalar_lea.hbm %s2119_s1, 256 }
  0xb1   : > { %p1461_p4 = scmp.ne.s32.totalorder %s1889_s12, %s1460_s17  ;;  %p1466_p0 = scmp.lt.u32.totalorder %s1889_s12, %s2119_s1 }
  0xb2   : > { %p1467_p7 = scmp.lt.u32.totalorder %s1465_s10, %s1460_s17  ;;  %p1469_p8 = scmp.lt.u32.totalorder %s1460_s17, %s1889_s12 }
  0xb3   : > { %p1463_p9 = pnand %p1461_p4, %p1432_p1 }
  0xb4   : > { %p1468_p5 = por %p1467_p7, %p1466_p0 }
  0xb5   : > { %p1464_p11 = pneg %p1463_p9 }
  0xb6   : > { %p1470_p3 = por %p1469_p8, %p1468_p5 }
  0xb8   : > { %p1471_p12 = pnand %p1470_p3, %p1464_p11 }
  0xba   : > { %1474 = shalt.err (!%p1471_p12)
}
  0xbb   : > { %s1475_s2 = scalar_lea.vmem %s338_s7, 128  ;;  %s1629_s16 = smov [#allocation5]  }
  0xbc   : > { %p1476_p6 = scmp.ne.s32.totalorder %s338_s7, %s1475_s2  ;;  %s1480_s14 = sshll.u32 %s1629_s16, 4  ;;  %s1481_s14 = int_to_ptr.vmem [resolvable:$false] %s1480_s14 }
  0xbd   : > { %s1482_s21 = scalar_lea.vmem %s1481_s14, 256  ;;  %p1483_p9 = scmp.lt.s32.totalorder %s338_s7, %s1481_s14 }
  0xbe   : > { %p1478_p13 = pnand %p1476_p6, %p1432_p1  ;;  %p1484_p2 = scmp.lt.s32.totalorder %s1482_s21, %s1475_s2 }
  0xc0   : > { %p1479_p4 = pneg %p1478_p13  ;;  %p1485_p0 = por %p1484_p2, %p1483_p9 }
  0xc2   : > { %p1486_p7 = pnand %p1485_p0, %p1479_p4 }
  0xc4   : > { %1489 = shalt.err (!%p1486_p7)
}
  0xc5   : > { %1232 = dma.hbm_to_vmem [thread:$0]  (!%p1880_p10), %s1889_s12, 128, %s338_s7, %s326_s15  }
  0xc6   : > { %p2151_p11 = scmp.ne.s32.totalorder %s2137_s8, 0 }
  0xc7   : > { %s1940_s3 = sand.u32 (!%p2151_p11), 1, %s1604_s25   ;;  %p2152_p1 = scmp.ne.s32.totalorder (!%p2151_p11), %s2147_s19, 0 }
  0xc8   : > { %346 = sbr.rel (%p2151_p11) target bundleno = 633 (0x279), region = 44  ;;  %s1141_s4 = sshll.u32 (!%p2151_p11), %s1940_s3, 3 }
  0xc9   : > { %s349_s17 = scalar_lea.sflag (!%p2151_p11), [#allocation3], %s1940_s3  ;;  %s352_s13 = scalar_lea.vmem (!%p2151_p11), [#allocation2], %s1141_s4 }
  0xcf   : > { %1571 = dma.done.wait (%p2152_p1), %s349_s17, 128  }
  0xd0   : > { %1573 = vsyncadd (%p2152_p1), %s349_s17, 4294967168  ;;  %s357_s11 = sand.u32 1, %s1713_s30   ;;  %s361_s8 = scalar_lea.vmem [#allocation5], %s1141_s4 }
  0xd1   : > { %s358_s12 = scalar_lea.sflag [#allocation6], %s357_s11 }
  0xd2   : > { %1575 = dma.done.wait (%p2152_p1), %s358_s12, 128  }
  0xd3   : > { %1577 = vsyncadd (%p2152_p1), %s358_s12, 4294967168  ;;  %p2153_p2 = scmp.eq.s32.totalorder %s1713_s30, 0 }
  0xd5   : > { %1579 = dma.done.wait (%p2153_p2), [#allocation6], 256   ;;  %p2154_p10 = pmov %p2153_p2 }
  0xd6   : > { %p2155_p5 = pmov %p2153_p2 }
  0xd7   : > { %1581 = vsyncadd (%p2154_p10), [#allocation6], 4294967040 }
  0xd8   : > { %1583 = dma.done.wait (%p2155_p5), [#allocation9], 272   ;;  %p2156_p8 = pmov %p2153_p2 }
  0xd9   : > { %p2157_p3 = pmov %p2153_p2 }
  0xda   : > { %1585 = vsyncadd (%p2156_p8), [#allocation9], 4294967024 }
  0xdb   : > { %1587 = dma.done.wait (%p2157_p3), [#allocation12], 16   ;;  %p2158_p12 = pmov %p2153_p2 }
  0xdc   : > { %v1630_v0 = vmov 0.0   ;;  %vm1631_vm0 = vmmov 0   ;;  %v1314_v1 = vld [vmem:[#allocation7] sm:$0xff]   ;;  %v1315_v2 = vld [vmem:[#allocation10] sm:$0xff]   ;;  %v1316_v3 = vld [vmem:[#allocation7 + $0x8] sm:$0xff]   ;;  %vm444_vm1 = vcmask 261120   ;;  %v567_v25 = vlaneseq }
  0xdd   : > { %1589 = vsyncadd (%p2158_p12), [#allocation12], 4294967280  ;;  %1173 = vmatprep.subr.bf16.mxu0 %v1630_v0  ;;  %1181 = vmatprep.subr.bf16.mxu1 %v1630_v0  ;;  %v1317_v4 = vld [vmem:[#allocation10 + $0x8] sm:$0xff]   ;;  %v1149_v9 = vld [vmem:[#allocation8] ss:$0 sm:$0xff]  ;;  %s1632_s30 = smov 104  }
  0xde   : > { %1177 = vmatprep.mubr.msk.bf16.mxu0 %vm1631_vm0, %v1630_v0  ;;  %1185 = vmatprep.mubr.msk.bf16.mxu1 %vm1631_vm0, %v1630_v0  ;;  %v419_v5 = vld [vmem:[%s352_s13] sm:$0xff]  ;;  %v488_v6 = vld [vmem:[%s361_s8] sm:$0xff]  ;;  %s1633_s19 = smov 120   ;;  %s1634_s7 = smov 112   ;;  %v1635_v23 = vmov 1983009808  }
  0xdf   : > { %1174 = vmatpush3.bf16.msra.mxu0 %v1314_v1  ;;  %1182 = vmatpush3.bf16.msra.mxu1 %v1315_v2  ;;  %v420_v7 = vpack.c.bf16 %v419_v5, %v419_v5  ;;  %v489_v8 = vpack.c.bf16 %v488_v6, %v488_v6  ;;  %v1153_v10 = vld [vmem:[#allocation11] ss:$0 sm:$0xff]  ;;  %v565_v24 = vunpack.c.l.s4 %v1635_v23  ;;  %v1636_v26 = vmov 1934713408   ;;  %s1147_s15 = sshll.u32 %s1940_s3, 4  ;;  %s1165_s9 = sshll.u32 %s1612_s27, 8 }
  0xe0   : > { %1175 = vmatprep.subr.bf16.mxu0 %v1630_v0  ;;  %1183 = vmatprep.subr.bf16.mxu1 %v1630_v0  ;;  %v582_v27 = vunpack.c.l.s4 %v1636_v26  ;;  %v568_v29 = vshrl.u32 %v567_v25, 7  ;;  %v1637_v45 = vmov 0   ;;  %vm729_vm2 = vcmask 60416   ;;  %s410_s10 = scalar_lea.vmem [#allocation13], %s1147_s15  ;;  %s2015_s16 = scalar_lea.hbm %s2124_s6, %s1165_s9 }
  0xe1   : > { %v566_v28 = vunpack.c.0.s8 %v565_v24  ;;  %s931_s18 = sshll.u32 %s410_s10, 4  ;;  %s912_s14 = scalar_lea.sflag [#allocation4], %s1940_s3  ;;  %s2017_s18 = int_to_ptr.vmem [resolvable:$true] %s931_s18 }
  0xe2   : > { %v583_v30 = vunpack.c.0.s8 %v582_v27  ;;  %s1490_s21 = scalar_lea.vmem %s2017_s18, 256  ;;  %p2159_p13 = scmp.ne.s32.totalorder %s2148_s20, 0 }
  0xe3   : > { %1176 = vmatpush3.bf16.msra.mxu0 %v1316_v3  ;;  %1184 = vmatpush3.bf16.msra.mxu1 %v1317_v4  ;;  %v1965_v31 = vsub.s32 %v566_v28, %v568_v29  ;;  %p1491_p6 = scmp.ne.s32.totalorder %s2017_s18, %s1490_s21  ;;  %s1638_s4 = smov [#allocation13]  }
  0xe4   : > { %v1968_v35 = vsub.s32 %v583_v30, %v568_v29  ;;  %s1494_s17 = sshll.u32 %s1638_s4, 4  ;;  %s1495_s17 = int_to_ptr.vmem [resolvable:$false] %s1494_s17 }
  0xe5   : > { %p1492_p4 = pnand %p1491_p6, %p2159_p13  ;;  %s1496_s13 = scalar_lea.vmem %s1495_s17, 512 }
  0xe6   : > { %1178 = vmatmul.mubr.msk.bf16.vlgmr.msra.gmra.mrb[0].mxu0 %vm444_vm1, %v420_v7  ;;  %1186 = vmatmul.mubr.msk.bf16.vlgmr.msra.gmra.mrb[0].mxu1 %vm444_vm1, %v489_v8  ;;  %p1497_p0 = scmp.lt.s32.totalorder %s2017_s18, %s1495_s17  ;;  %p1498_p7 = scmp.lt.s32.totalorder %s1496_s13, %s1490_s21 }
  0xe7   : > { %p1493_p9 = pneg %p1492_p4 }
  0xe8   : > { %p1499_p11 = por %p1498_p7, %p1497_p0 }
  0xea   : > { %p1500_p1 = pnand %p1499_p11, %p1493_p9 }
 0x1b9   : > { %v482_v11 = vpop.f32.mrb[0].mxu0  ;;  %v550_v14 = vpop.f32.mrb[0].mxu1 }
 0x1ba   : > { %v483_v12 = vadd.f32 %v1149_v9, %v482_v11  ;;  %v1179_v13 = vpop.f32.mrb[1].mxu0  ;;  %v551_v15 = vadd.f32 %v1153_v10, %v550_v14  ;;  %v1187_v17 = vpop.f32.mrb[1].mxu1 }
 0x1bb   : > { %v485_v16 = vpop.f32.mrb[2].mxu0  ;;  %v553_v20 = vpop.f32.mrb[2].mxu1 }
 0x1bc   : > { %v556_v18 = vpack.c.bf16 %v483_v12, %v483_v12  ;;  %v1180_v19 = vpop.f32.mrb[3].mxu0  ;;  %v1188_v21 = vpop.f32.mrb[3].mxu1  ;;  %v734_v22 = vpack.c.bf16 %v551_v15, %v551_v15 }
 0x1be   : > { %562 = vrot.lane.b32.xlu1 %v556_v18, %s1632_s30  ;;  %558 = vrot.lane.b32.xlu0 %v556_v18, %s1633_s19  ;;  %v570_v44 = vrot.slane %v556_v18, %v1965_v31  ;;  %v748_v52 = vrot.slane %v734_v22, %v1965_v31 }
 0x1c2   : > { %736 = vrot.lane.b32.xlu1 %v734_v22, %s1633_s19  ;;  %560 = vrot.lane.b32.xlu0 %v556_v18, %s1634_s7 }
 0x1c6   : > { %740 = vrot.lane.b32.xlu1 %v734_v22, %s1632_s30  ;;  %738 = vrot.lane.b32.xlu0 %v734_v22, %s1634_s7 }
 0x230   : > { %v563_v32 = vpop.permute.xlu1 %562  ;;  %v559_v33 = vpop.permute.xlu0 %558 }
 0x231   : > { %v612_v34 = vrot.slane %v563_v32, %v1965_v31  ;;  %v604_v36 = vrot.slane %v559_v33, %v1965_v31 }
 0x233   : > { %v613_v37 = vcombine.low %v604_v36, %v612_v34  ;;  %v614_v38 = vcombine.high %v604_v36, %v612_v34 }
 0x234   : > { %v737_v39 = vpop.permute.xlu1 %736  ;;  %v561_v40 = vpop.permute.xlu0 %560 }
 0x235   : > { %v621_v41 = vrot.slane %v613_v37, %v1968_v35  ;;  %v628_v42 = vrot.slane %v614_v38, %v1968_v35  ;;  %v578_v43 = vrot.slane %v561_v40, %v1965_v31  ;;  %v782_v48 = vrot.slane %v737_v39, %v1965_v31 }
 0x237   : > { %v629_v46 = vcombine.high %v621_v41, %v1637_v45  ;;  %v630_v47 = vcombine.high %v628_v42, %v1637_v45  ;;  %v579_v49 = vcombine.low %v570_v44, %v578_v43  ;;  %v580_v50 = vcombine.high %v570_v44, %v578_v43 }
 0x238   : > { %v741_v51 = vpop.permute.xlu1 %740  ;;  %v739_v53 = vpop.permute.xlu0 %738  ;;  %v636_v54 = vshrl.u32 %v621_v41, 16  ;;  %v652_v55 = vshrl.u32 %v628_v42, 16 }
 0x239   : > { %v790_v56 = vrot.slane %v741_v51, %v1965_v31  ;;  %v756_v57 = vrot.slane %v739_v53, %v1965_v31  ;;  %v644_v58 = vshrl.u32 %v629_v46, 16  ;;  %v660_v59 = vshrl.u32 %v630_v47, 16 }
 0x23a   : > { %v587_v60 = vrot.slane %v579_v49, %v1968_v35  ;;  %v594_v61 = vrot.slane %v580_v50, %v1968_v35 }
 0x23b   : > { %v791_v62 = vcombine.low %v782_v48, %v790_v56  ;;  %v792_v63 = vcombine.high %v782_v48, %v790_v56  ;;  %v757_v0 = vcombine.low %v748_v52, %v756_v57  ;;  %v758_v1 = vcombine.high %v748_v52, %v756_v57 }
 0x23c   : > { %v595_v2 = vcombine.high %v587_v60, %v1637_v45  ;;  %v596_v3 = vcombine.high %v594_v61, %v1637_v45  ;;  %v633_v4 = vpack.i.b16 %v621_v41, %v587_v60  ;;  %v635_v5 = vshrl.u32 %v587_v60, 16 }
 0x23d   : > { %v649_v6 = vpack.i.b16 %v628_v42, %v594_v61  ;;  %v651_v7 = vshrl.u32 %v594_v61, 16  ;;  %v799_v8 = vrot.slane %v791_v62, %v1968_v35  ;;  %v806_v9 = vrot.slane %v792_v63, %v1968_v35 }
 0x23e   : > { %v637_v10 = vpack.i.b16 %v636_v54, %v635_v5  ;;  %v641_v11 = vpack.i.b16 %v629_v46, %v595_v2  ;;  %v643_v12 = vshrl.u32 %v595_v2, 16  ;;  %v657_v13 = vpack.i.b16 %v630_v47, %v596_v3 }
 0x23f   : > { %v653_v14 = vpack.i.b16 %v652_v55, %v651_v7  ;;  %v659_v15 = vshrl.u32 %v596_v3, 16  ;;  %v663_v16 = vcombine.low %v633_v4, %v649_v6  ;;  %v807_v17 = vcombine.high %v799_v8, %v1637_v45 }
 0x240   : > { %v645_v18 = vpack.i.b16 %v644_v58, %v643_v12  ;;  %v671_v19 = vcombine.low %v641_v11, %v657_v13  ;;  %v808_v20 = vcombine.high %v806_v9, %v1637_v45  ;;  %v814_v24 = vshrl.u32 %v799_v8, 16 }
 0x241   : > { %v661_v21 = vpack.i.b16 %v660_v59, %v659_v15  ;;  %v670_v22 = vrot.slane %v663_v16, %v1965_v31  ;;  %v688_v23 = vcombine.low %v637_v10, %v653_v14  ;;  %v822_v26 = vshrl.u32 %v807_v17, 16 }
 0x242   : > { %v678_v25 = vrot.slane %v671_v19, %v1965_v31  ;;  %v830_v27 = vshrl.u32 %v806_v9, 16  ;;  %v765_v28 = vrot.slane %v757_v0, %v1968_v35  ;;  %v838_v32 = vshrl.u32 %v808_v20, 16 }
 0x243   : > { %v695_v29 = vrot.slane %v688_v23, %v1965_v31  ;;  %v696_v30 = vcombine.low %v645_v18, %v661_v21  ;;  %v772_v33 = vrot.slane %v758_v1, %v1968_v35 }
 0x244   : > { %v679_v34 = vcombine.low %v670_v22, %v678_v25  ;;  %v773_v36 = vcombine.high %v765_v28, %v1637_v45  ;;  %v811_v37 = vpack.i.b16 %v799_v8, %v765_v28  ;;  %v813_v38 = vshrl.u32 %v765_v28, 16 }
 0x245   : > { %v703_v39 = vrot.slane %v696_v30, %v1965_v31  ;;  %v774_v40 = vcombine.high %v772_v33, %v1637_v45  ;;  %v827_v41 = vpack.i.b16 %v806_v9, %v772_v33  ;;  %v829_v42 = vshrl.u32 %v772_v33, 16 }
 0x246   : > { %v686_v43 = vrot.slane %v679_v34, %v1968_v35  ;;  %v815_v44 = vpack.i.b16 %v814_v24, %v813_v38  ;;  %v819_v46 = vpack.i.b16 %v807_v17, %v773_v36  ;;  %v821_v47 = vshrl.u32 %v773_v36, 16 }
 0x247   : > { %v704_v48 = vcombine.low %v695_v29, %v703_v39  ;;  %v831_v49 = vpack.i.b16 %v830_v27, %v829_v42  ;;  %v835_v50 = vpack.i.b16 %v808_v20, %v774_v40  ;;  %v837_v51 = vshrl.u32 %v774_v40, 16 }
 0x248   : > { %v687_v52 = vcombine.high %v686_v43, %v1637_v45  ;;  %v823_v53 = vpack.i.b16 %v822_v26, %v821_v47  ;;  %v841_v54 = vcombine.low %v811_v37, %v827_v41  ;;  %v717_v58 = vshrl.u32 %v686_v43, 16 }
 0x249   : > { %v711_v55 = vrot.slane %v704_v48, %v1968_v35  ;;  %v839_v56 = vpack.i.b16 %v838_v32, %v837_v51  ;;  %v849_v57 = vcombine.low %v819_v46, %v835_v50  ;;  %v866_v60 = vcombine.low %v815_v44, %v831_v49 }
 0x24a   : > { %v848_v59 = vrot.slane %v841_v54, %v1965_v31  ;;  %v725_v1 = vshrl.u32 %v687_v52, 16 }
 0x24b   : > { %v712_v61 = vcombine.high %v711_v55, %v1637_v45  ;;  %v715_v62 = vpack.i.b16 %v711_v55, %v686_v43  ;;  %v718_v63 = vshrl.u32 %v711_v55, 16  ;;  %v856_v0 = vrot.slane %v849_v57, %v1965_v31 }
 0x24c   : > { %v874_v2 = vcombine.low %v823_v53, %v839_v56  ;;  %v873_v7 = vrot.slane %v866_v60, %v1965_v31 }
 0x24d   : > { %v719_v3 = vpack.i.b16 %v718_v63, %v717_v58  ;;  %v723_v4 = vpack.i.b16 %v712_v61, %v687_v52  ;;  %v726_v5 = vshrl.u32 %v712_v61, 16  ;;  %v857_v6 = vcombine.low %v848_v59, %v856_v0  ;;  %730 = vst.msk [vmem:[%s410_s10] sm:$0xf] %vm729_vm2, %v715_v62 }
 0x24e   : > { %v881_v8 = vrot.slane %v874_v2, %v1965_v31 }
 0x24f   : > { %v727_v9 = vpack.i.b16 %v726_v5, %v725_v1  ;;  %v864_v10 = vrot.slane %v857_v6, %v1968_v35  ;;  %731 = vst.msk [vmem:[%s410_s10 + $0x4] sm:$0xf] %vm729_vm2, %v719_v3  ;;  %732 = vst.msk [vmem:[%s410_s10 + $0x8] sm:$0xf] %vm729_vm2, %v723_v4 }
 0x250   : > { %v882_v11 = vcombine.low %v873_v7, %v881_v8 }
 0x251   : > { %733 = vst.msk [vmem:[%s410_s10 + $0xc] sm:$0xf] %vm729_vm2, %v727_v9  ;;  %v865_v31 = vcombine.high %v864_v10, %v1637_v45 }
 0x252   : > { %v889_v12 = vrot.slane %v882_v11, %v1968_v35 }
 0x253   : > { %1503 = shalt.err (!%p1500_p1)
}
 0x254   : > { %s1504_s11 = scalar_lea.hbm %s2015_s16, 256  ;;  %s1508_s30 = scalar_lea.hbm %s2124_s6, 512 }
 0x255   : > { %p1505_p2 = scmp.ne.s32.totalorder %s2015_s16, %s1504_s11  ;;  %p1509_p8 = scmp.lt.u32.totalorder %s2015_s16, %s2124_s6 }
 0x256   : > { %p1510_p3 = scmp.lt.u32.totalorder %s1508_s30, %s1504_s11  ;;  %p1512_p6 = scmp.lt.u32.totalorder %s1504_s11, %s2015_s16 }
 0x257   : > { %p1506_p10 = pnand %p1505_p2, %p2159_p13 }
 0x258   : > { %p1511_p12 = por %p1510_p3, %p1509_p8 }
 0x259   : > { %p1507_p5 = pneg %p1506_p10 }
 0x25a   : > { %p1513_p4 = por %p1512_p6, %p1511_p12 }
 0x25c   : > { %p1514_p9 = pnand %p1513_p4, %p1507_p5 }
 0x25e   : > { %1517 = shalt.err (!%p1514_p9)
}
 0x25f   : > { %s1639_s10 = smov 64   ;;  %s1640_s5 = smov 4   ;;  %v890_v35 = vcombine.high %v889_v12, %v1637_v45  ;;  %v893_v13 = vpack.i.b16 %v889_v12, %v864_v10  ;;  %v895_v14 = vshrl.u32 %v864_v10, 16  ;;  %v896_v15 = vshrl.u32 %v889_v12, 16 }
 0x260   : > { %1209 = dma.vmem_to_hbm [thread:$0]  (%p2159_p13), %s2017_s18, 256, %s2015_s16, %s912_s14, %s1639_s10, %s1639_s10, %s1640_s5   ;;  %v903_v18 = vshrl.u32 %v865_v31, 16 }
 0x261   : > { %s417_s2 = scalar_lea.vmem [#allocation14], %s1147_s15  ;;  %v897_v16 = vpack.i.b16 %v896_v15, %v895_v14  ;;  %v901_v17 = vpack.i.b16 %v890_v35, %v865_v31  ;;  %v904_v19 = vshrl.u32 %v890_v35, 16  ;;  %s2160_s14 = sld [smem:[#allocation28_spill]] }
 0x262   : > { %s948_s21 = sshll.u32 %s417_s2, 4  ;;  %907 = vst.msk [vmem:[%s417_s2] sm:$0xf] %vm729_vm2, %v893_v13  ;;  %s917_s15 = scalar_lea.sflag [#allocation15], %s1940_s3  ;;  %s2065_s21 = int_to_ptr.vmem [resolvable:$true] %s948_s21 }
 0x263   : > { %v905_v20 = vpack.i.b16 %v904_v19, %v903_v18  ;;  %908 = vst.msk [vmem:[%s417_s2 + $0x4] sm:$0xf] %vm729_vm2, %v897_v16  ;;  %909 = vst.msk [vmem:[%s417_s2 + $0x8] sm:$0xf] %vm729_vm2, %v901_v17  ;;  %s1518_s17 = scalar_lea.vmem %s2065_s21, 256  ;;  %s1641_s13 = smov [#allocation14]  }
 0x264   : > { %p1519_p0 = scmp.ne.s32.totalorder %s2065_s21, %s1518_s17  ;;  %s1522_s27 = sshll.u32 %s1641_s13, 4  ;;  %s1523_s27 = int_to_ptr.vmem [resolvable:$false] %s1522_s27 }
 0x265   : > { %910 = vst.msk [vmem:[%s417_s2 + $0xc] sm:$0xf] %vm729_vm2, %v905_v20  ;;  %s1524_s11 = scalar_lea.vmem %s1523_s27, 512  ;;  %p1525_p1 = scmp.lt.s32.totalorder %s2065_s21, %s1523_s27 }
 0x266   : > { %p1520_p7 = pnand %p1519_p0, %p2159_p13  ;;  %p1526_p2 = scmp.lt.s32.totalorder %s1524_s11, %s1518_s17 }
 0x267   : > { %s2063_s4 = scalar_lea.hbm %s2160_s14, %s1165_s9 }
 0x268   : > { %p1521_p11 = pneg %p1520_p7  ;;  %p1527_p10 = por %p1526_p2, %p1525_p1 }
 0x26a   : > { %p1528_p5 = pnand %p1527_p10, %p1521_p11 }
 0x26c   : > { %1531 = shalt.err (!%p1528_p5)
}
 0x26d   : > { %s1532_s9 = scalar_lea.hbm %s2063_s4, 256  ;;  %s1536_s30 = scalar_lea.hbm %s2160_s14, 512 }
 0x26e   : > { %p1533_p8 = scmp.ne.s32.totalorder %s2063_s4, %s1532_s9  ;;  %p1537_p6 = scmp.lt.u32.totalorder %s2063_s4, %s2160_s14 }
 0x26f   : > { %p1538_p4 = scmp.lt.u32.totalorder %s1536_s30, %s1532_s9  ;;  %p1540_p0 = scmp.lt.u32.totalorder %s1532_s9, %s2063_s4 }
 0x270   : > { %p1534_p3 = pnand %p1533_p8, %p2159_p13 }
 0x271   : > { %p1539_p9 = por %p1538_p4, %p1537_p6 }
 0x272   : > { %p1535_p12 = pneg %p1534_p3 }
 0x273   : > { %p1541_p7 = por %p1540_p0, %p1539_p9 }
 0x275   : > { %p1542_p11 = pnand %p1541_p7, %p1535_p12 }
 0x277   : > { %1545 = shalt.err (!%p1542_p11)
}
 0x278   : > { %1210 = dma.vmem_to_hbm [thread:$0]  (%p2159_p13), %s2065_s21, 256, %s2063_s4, %s917_s15, %s1639_s10, %s1639_s10, %s1640_s5  }
 0x279 PF: > { %s963_s2 = sand.u32 1, %s1600_s24   ;;  %p2161_p1 = scmp.ne.s32.totalorder %s2149_s23, 0 }
 0x27a   : > { %p2162_p2 = scmp.ge.s32.totalorder %s1620_s29, 2  ;;  %s964_s18 = scalar_lea.sflag [#allocation4], %s963_s2 }
 0x27c   : > { %p1234_p10 = pnand %p2162_p2, %p2161_p1 }
 0x27e   : > { %1591 = dma.done.wait (!%p1234_p10), %s964_s18, 256  }
 0x27f   : > { %1593 = vsyncadd (!%p1234_p10), %s964_s18, 4294967040  ;;  %s973_s20 = scalar_lea.sflag [#allocation15], %s963_s2 }
 0x280   : > { %1595 = dma.done.wait (!%p1234_p10), %s973_s20, 256  }
 0x281   : > { %1597 = vsyncadd (!%p1234_p10), %s973_s20, 4294967040  ;;  %s32_s29 = sadd.s32 1, %s1620_s29   ;;  %s2163_s3 = sld [smem:[#allocation23_spill]] }
 0x282   : > { %p29_p5 = scmp.ge.s32.totalorder %s32_s29, 4   ;;  %s2164_s24 = smov %s1604_s25 }
 0x283   : > { %s2165_s25 = smov %s1608_s26  ;;  %s2166_s26 = smov %s1861_s22 }
 0x284   : > { %s2167_s27 = smov %s1616_s28  ;;  %31 = sbr.rel (!%p29_p5) target bundleno = 18 (0x12), region = 135 }
 0x287   : > { %s2168_s28 = smov %s2163_s3 }
 0x28b   :  { %978 = vsyncpa [#allocation3], 1 }
 0x28c   :  { %980 = vsyncpa [#allocation3 + $0x1], 1 }
 0x28d   :  { %981 = vsyncpa [#allocation6], 1 }
 0x28e   :  { %983 = vsyncpa [#allocation6 + $0x1], 1 }
 0x28f   :  { %984 = vsyncpa [#allocation9], 1 }
 0x290   :  { %985 = vsyncpa [#allocation12], 1 }
 0x291   :  { %986 = vsyncpa [#allocation4], 1 }
 0x292   :  { %988 = vsyncpa [#allocation4 + $0x1], 1 }
 0x293   :  { %989 = vsyncpa [#allocation15], 1 }
 0x294   :  { %991 = vsyncpa [#allocation15 + $0x1], 1 }

</bundles_post_ra>
